<compile_context>
chip_gen: v6e
topology: v6e:2x2x1
jax: 0.10.0
libtpu: 0.0.40
codegen_flags: <defaults>
</compile_context>

<pallas_src>
import functools
import math

import jax
import jax.numpy as jnp
from jax import lax
from jax.experimental import pallas as pl
from jax.experimental.pallas import tpu as pltpu


def _pick_tile(dim, candidates):
    """Largest candidate that divides `dim`, else the full dim (always legal)."""
    for c in candidates:
        if dim % c == 0:
            return c
    return dim


# ----------------------------------------------------------------------------
# Kernel 1: tiled matmul + bias  (out = x @ w + b), fp32 accumulate, bf16 out.
# ----------------------------------------------------------------------------
def _linear_kernel(x_ref, w_ref, b_ref, o_ref, acc_ref):
    kk = pl.program_id(2)

    @pl.when(kk == 0)
    def _init():
        # Fold the bias into the accumulator init (broadcast over the tm rows).
        acc_ref[...] = jnp.broadcast_to(
            b_ref[...].astype(jnp.float32), acc_ref.shape)

    acc_ref[...] += jnp.dot(x_ref[...], w_ref[...],
                            preferred_element_type=jnp.float32)

    @pl.when(kk == pl.num_programs(2) - 1)
    def _finalize():
        o_ref[...] = acc_ref[...].astype(o_ref.dtype)


def linear(x, w, b):
    """x: (M, K) bf16, w: (K, N) bf16, b: (N,) bf16 -> (M, N) bf16."""
    M, K = x.shape
    Kw, N = w.shape
    assert K == Kw

    # v6e/v7x-friendly targets; fall back to divisors / full dims.
    tm = _pick_tile(M, (256, 128, 64, 32, 16, 8))   # sublane dim: mult of 8 or full
    tn = _pick_tile(N, (256, 128))                  # lane dim: mult of 128 or full
    tk = _pick_tile(K, (512, 256, 128))             # mult of 128 or full

    grid = (M // tm, N // tn, K // tk)
    b2 = b.reshape(1, N)

    cost = pl.CostEstimate(
        flops=2 * M * N * K,
        transcendentals=0,
        bytes_accessed=int(2 * (M * K + K * N + N + M * N)))

    return pl.pallas_call(
        _linear_kernel,
        out_shape=jax.ShapeDtypeStruct((M, N), jnp.bfloat16),
        grid_spec=pltpu.PrefetchScalarGridSpec(
            num_scalar_prefetch=0,
            grid=grid,
            in_specs=[
                pl.BlockSpec((tm, tk), lambda i, j, k: (i, k)),
                pl.BlockSpec((tk, tn), lambda i, j, k: (k, j)),
                pl.BlockSpec((1, tn), lambda i, j, k: (0, j)),
            ],
            out_specs=pl.BlockSpec((tm, tn), lambda i, j, k: (i, j)),
            scratch_shapes=[pltpu.VMEM((tm, tn), jnp.float32)],
        ),
        compiler_params=pltpu.CompilerParams(
            dimension_semantics=("parallel", "parallel", "arbitrary")),
        cost_estimate=cost,
    )(x, w, b2)


# ----------------------------------------------------------------------------
# Kernel 2: flash-style causal attention with online softmax.
# Grid: (B*H, q_tiles, kv_tiles), kv innermost ("arbitrary").
# ----------------------------------------------------------------------------
def _flash_attn_kernel(q_ref, k_ref, v_ref, o_ref, qs_sc, m_sc, l_sc, acc_sc,
                       *, tq, tk, scale):
    qi = pl.program_id(1)
    ki = pl.program_id(2)

    @pl.when(ki == 0)
    def _init():
        # Scale q once per q tile (fp32 mul, bf16 store) and reuse for all kv.
        qs_sc[...] = (q_ref[0].astype(jnp.float32) * scale).astype(jnp.bfloat16)
        m_sc[...] = jnp.full_like(m_sc, -jnp.inf)
        l_sc[...] = jnp.zeros_like(l_sc)
        acc_sc[...] = jnp.zeros_like(acc_sc)

    q0 = qi * tq
    k0 = ki * tk

    def _scores():
        return lax.dot_general(qs_sc[...], k_ref[0], (((1,), (1,)), ((), ())),
                               preferred_element_type=jnp.float32)

    def _update(s):
        m_prev = m_sc[...]
        m_new = jnp.maximum(m_prev, jnp.max(s, axis=-1, keepdims=True))
        alpha = jnp.exp(m_prev - m_new)
        p = jnp.exp(s - m_new)
        l_sc[...] = alpha * l_sc[...] + jnp.sum(p, axis=-1, keepdims=True)
        acc_sc[...] = alpha * acc_sc[...] + jnp.dot(
            p.astype(v_ref.dtype), v_ref[0], preferred_element_type=jnp.float32)
        m_sc[...] = m_new

    # Interior (fully unmasked) causal blocks: every col <= every row.
    @pl.when(k0 + tk - 1 <= q0)
    def _interior():
        _update(_scores())

    # Diagonal blocks: straddle the causal boundary -> apply the mask here only.
    @pl.when(jnp.logical_and(k0 + tk - 1 > q0, k0 <= q0 + tq - 1))
    def _diag():
        s = _scores()
        row = q0 + lax.broadcasted_iota(jnp.int32, (tq, tk), 0)
        col = k0 + lax.broadcasted_iota(jnp.int32, (tq, tk), 1)
        _update(jnp.where(row >= col, s, jnp.float32(-1e30)))

    # (Blocks fully above the diagonal: no compute; the clamped K/V index_map
    #  also means no fresh DMA is issued for them.)

    @pl.when(ki == pl.num_programs(2) - 1)
    def _finalize():
        inv = pl.reciprocal(l_sc[...], approx=True)
        o_ref[0] = (acc_sc[...] * inv).astype(o_ref.dtype)


def causal_attention(q, k, v):
    """q, k, v: (B*H, T, D) bf16 -> (B*H, T, D) bf16, causal."""
    BH, T, D = q.shape
    tq = _pick_tile(T, (256, 128, 64, 32, 16, 8))
    tk = _pick_tile(T, (256, 128, 64, 32, 16, 8))
    n_q, n_kv = T // tq, T // tk
    scale = 1.0 / math.sqrt(D)

    # Clamp the kv block index so no DMA goes past the causal diagonal
    # (same block index as previous step => Pallas skips the re-fetch).
    def kv_index(bh, qi, ki):
        return (bh, jnp.minimum(ki, ((qi + 1) * tq - 1) // tk), 0)

    kernel = functools.partial(_flash_attn_kernel, tq=tq, tk=tk, scale=scale)

    cost = pl.CostEstimate(
        flops=int(2 * BH * T * T * D),            # ~half of 2*(QK^T)+2*(PV): causal
        transcendentals=int(BH * T * T // 2),
        bytes_accessed=int(4 * BH * T * D * 2))

    return pl.pallas_call(
        kernel,
        out_shape=jax.ShapeDtypeStruct((BH, T, D), jnp.bfloat16),
        grid_spec=pltpu.PrefetchScalarGridSpec(
            num_scalar_prefetch=0,
            grid=(BH, n_q, n_kv),
            in_specs=[
                pl.BlockSpec((1, tq, D), lambda bh, qi, ki: (bh, qi, 0)),
                pl.BlockSpec((1, tk, D), kv_index),
                pl.BlockSpec((1, tk, D), kv_index),
            ],
            out_specs=pl.BlockSpec((1, tq, D), lambda bh, qi, ki: (bh, qi, 0)),
            scratch_shapes=[
                pltpu.VMEM((tq, D), jnp.bfloat16),  # pre-scaled q tile
                pltpu.VMEM((tq, 1), jnp.float32),   # running max m
                pltpu.VMEM((tq, 1), jnp.float32),   # running denom l
                pltpu.VMEM((tq, D), jnp.float32),   # fp32 output accumulator
            ],
        ),
        compiler_params=pltpu.CompilerParams(
            dimension_semantics=("parallel", "parallel", "arbitrary")),
        cost_estimate=cost,
    )(q, k, v)


# ----------------------------------------------------------------------------
# Module-level forward: CausalSelfAttention.forward
# ----------------------------------------------------------------------------
def causal_self_attention(x, params, n_head):
    """x: (B, T, C) -> (B, T, C), bf16 throughout (matching the torch module)."""
    x = x.astype(jnp.bfloat16)
    B, T, C = x.shape
    H = n_head
    D = C // H

    # c_attn: (B*T, C) @ (C, 3C) + b
    qkv = linear(x.reshape(B * T, C), params["w_attn"], params["b_attn"])
    qkv = qkv.reshape(B, T, 3, H, D)

    # TODO(synk): head split via BlockSpec index_map (and head packing for
    # D < 128) would avoid these HBM transposes.
    q = qkv[:, :, 0].transpose(0, 2, 1, 3).reshape(B * H, T, D)
    k = qkv[:, :, 1].transpose(0, 2, 1, 3).reshape(B * H, T, D)
    v = qkv[:, :, 2].transpose(0, 2, 1, 3).reshape(B * H, T, D)

    y = causal_attention(q, k, v)                                   # (B*H, T, D)
    y = y.reshape(B, H, T, D).transpose(0, 2, 1, 3).reshape(B * T, C)

    # c_proj
    y = linear(y, params["w_proj"], params["b_proj"])
    return y.reshape(B, T, C)


# ----------------------------------------------------------------------------
# Pure-JAX reference (for sanity check)
# ----------------------------------------------------------------------------
def reference(x, params, n_head):
    x = x.astype(jnp.bfloat16)
    B, T, C = x.shape
    D = C // n_head
    qkv = (x.reshape(B * T, C).astype(jnp.float32) @ params["w_attn"].astype(jnp.float32)
           + params["b_attn"].astype(jnp.float32)).reshape(B, T, 3 * C)
    q, k, v = jnp.split(qkv, 3, axis=2)
    q = q.reshape(B, T, n_head, D).transpose(0, 2, 1, 3)
    k = k.reshape(B, T, n_head, D).transpose(0, 2, 1, 3)
    v = v.reshape(B, T, n_head, D).transpose(0, 2, 1, 3)
    s = jnp.einsum("bhqd,bhkd->bhqk", q, k) / math.sqrt(D)
    mask = jnp.tril(jnp.ones((T, T), bool))
    s = jnp.where(mask, s, -1e30)
    p = jax.nn.softmax(s, axis=-1)
    y = jnp.einsum("bhqk,bhkd->bhqd", p, v)
    y = y.transpose(0, 2, 1, 3).reshape(B, T, C)
    y = y @ params["w_proj"].astype(jnp.float32) + params["b_proj"].astype(jnp.float32)
    return y


if __name__ == "__main__":
    # Small shapes consistent with the module.
    B, T, n_embd, n_head = 2, 8, 32, 4
    assert n_embd % n_head == 0

    key = jax.random.PRNGKey(0)
    k_x, k_wa, k_ba, k_wp, k_bp = jax.random.split(key, 5)

    # Deterministic parameter init (weights stored already transposed: (in, out)).
    params = {
        "w_attn": (0.02 * jax.random.normal(k_wa, (n_embd, 3 * n_embd))).astype(jnp.bfloat16),
        "b_attn": (0.02 * jax.random.normal(k_ba, (3 * n_embd,))).astype(jnp.bfloat16),
        "w_proj": (0.02 * jax.random.normal(k_wp, (n_embd, n_embd))).astype(jnp.bfloat16),
        "b_proj": (0.02 * jax.random.normal(k_bp, (n_embd,))).astype(jnp.bfloat16),
    }

    x = jax.random.normal(k_x, (B, T, n_embd), dtype=jnp.float32)

    y = causal_self_attention(x, params, n_head)
    y = jax.block_until_ready(y)

    # Loose sanity check against a pure-JAX reference (bf16 tolerance).
    y_ref = reference(x, params, n_head)
    assert y.shape == (B, T, n_embd) and y.dtype == jnp.bfloat16
    assert jnp.allclose(y.astype(jnp.float32), y_ref, atol=5e-2, rtol=5e-2)

    print("KERNEL_OK")
</pallas_src>

<mosaic_0001>
module attributes {stable_mosaic.version = 11 : i64} {
  func.func @_linear_kernel(%arg0: i32, %arg1: i32, %arg2: i32, %arg3: memref<16x32xbf16, #tpu.memory_space<vmem>>, %arg4: memref<32x96xbf16, #tpu.memory_space<vmem>>, %arg5: memref<1x96xbf16, #tpu.memory_space<vmem>>, %arg6: memref<16x96xbf16, #tpu.memory_space<vmem>>, %arg7: memref<16x96xf32, #tpu.memory_space<vmem>>) attributes {dimension_semantics = [#tpu.dimension_semantics<parallel>, #tpu.dimension_semantics<parallel>, #tpu.dimension_semantics<arbitrary>], iteration_bounds = array<i64: 1, 1, 1>, scalar_prefetch = 0 : i64, scratch_operands = 1 : i64, tpu.core_type = #tpu.core_type<tc>, window_params = [{transform_indices = @transform_0, window_bounds = array<i64: 16, 32>}, {transform_indices = @transform_1, window_bounds = array<i64: 32, 96>}, {transform_indices = @transform_2, window_bounds = array<i64: 1, 96>}, {transform_indices = @transform_3, window_bounds = array<i64: 16, 96>}]} {
    %c0_i32 = arith.constant 0 : i32
    %0 = arith.cmpi eq, %arg2, %c0_i32 : i32
    %1 = arith.extui %0 : i1 to i32
    %c0_i32_0 = arith.constant 0 : i32
    %2 = arith.cmpi ne, %1, %c0_i32_0 : i32
    scf.if %2 {
      %c0_10 = arith.constant 0 : index
      %c0_11 = arith.constant 0 : index
      %12 = vector.load %arg5[%c0_10, %c0_11] : memref<1x96xbf16, #tpu.memory_space<vmem>>, vector<1x96xbf16>
      %13 = arith.extf %12 : vector<1x96xbf16> to vector<1x96xf32>
      %14 = vector.shape_cast %13 : vector<1x96xf32> to vector<1x96xf32>
      %15 = vector.broadcast %14 : vector<1x96xf32> to vector<16x96xf32>
      %c0_12 = arith.constant 0 : index
      %c0_13 = arith.constant 0 : index
      %16 = vector.load %arg7[%c0_12, %c0_13] : memref<16x96xf32, #tpu.memory_space<vmem>>, vector<16x96xf32>
      tpu.vector_store %arg7[%c0_12, %c0_13], %15 {strides = array<i32>} : memref<16x96xf32, #tpu.memory_space<vmem>>, vector<16x96xf32>,
    } else {
    }
    %c0 = arith.constant 0 : index
    %c0_1 = arith.constant 0 : index
    %3 = vector.load %arg7[%c0, %c0_1] : memref<16x96xf32, #tpu.memory_space<vmem>>, vector<16x96xf32>
    %c0_2 = arith.constant 0 : index
    %c0_3 = arith.constant 0 : index
    %4 = vector.load %arg3[%c0_2, %c0_3] : memref<16x32xbf16, #tpu.memory_space<vmem>>, vector<16x32xbf16>
    %c0_4 = arith.constant 0 : index
    %c0_5 = arith.constant 0 : index
    %5 = vector.load %arg4[%c0_4, %c0_5] : memref<32x96xbf16, #tpu.memory_space<vmem>>, vector<32x96xbf16>
    %cst = arith.constant dense<0.000000e+00> : vector<16x96xf32>
    %6 = tpu.matmul %4, %5, %cst {dimension_numbers = #tpu.dot_dimension_numbers<[1], [0], [0], [1], [0, 0, 1, 1], [], []>} : vector<16x32xbf16>, vector<32x96xbf16>, vector<16x96xf32> -> vector<16x96xf32>
    %7 = arith.addf %3, %6 : vector<16x96xf32>
    %c0_6 = arith.constant 0 : index
    %c0_7 = arith.constant 0 : index
    %8 = vector.load %arg7[%c0_6, %c0_7] : memref<16x96xf32, #tpu.memory_space<vmem>>, vector<16x96xf32>
    tpu.vector_store %arg7[%c0_6, %c0_7], %7 {strides = array<i32>} : memref<16x96xf32, #tpu.memory_space<vmem>>, vector<16x96xf32>,
    %c0_i32_8 = arith.constant 0 : i32
    %9 = arith.cmpi eq, %arg2, %c0_i32_8 : i32
    %10 = arith.extui %9 : i1 to i32
    %c0_i32_9 = arith.constant 0 : i32
    %11 = arith.cmpi ne, %10, %c0_i32_9 : i32
    scf.if %11 {
      %c0_10 = arith.constant 0 : index
      %c0_11 = arith.constant 0 : index
      %12 = vector.load %arg7[%c0_10, %c0_11] : memref<16x96xf32, #tpu.memory_space<vmem>>, vector<16x96xf32>
      %13 = arith.truncf %12 : vector<16x96xf32> to vector<16x96xbf16>
      %c0_12 = arith.constant 0 : index
      %c0_13 = arith.constant 0 : index
      %14 = vector.load %arg6[%c0_12, %c0_13] : memref<16x96xbf16, #tpu.memory_space<vmem>>, vector<16x96xbf16>
      tpu.vector_store %arg6[%c0_12, %c0_13], %13 {strides = array<i32>} : memref<16x96xbf16, #tpu.memory_space<vmem>>, vector<16x96xbf16>,
    } else {
    }
    return
  }
  func.func @transform_0(%arg0: i32, %arg1: i32, %arg2: i32) -> (i32, i32) {
    %c0_i32 = arith.constant 0 : i32
    return %arg0, %arg2 : i32, i32
  }
  func.func @transform_1(%arg0: i32, %arg1: i32, %arg2: i32) -> (i32, i32) {
    %c0_i32 = arith.constant 0 : i32
    return %arg2, %arg1 : i32, i32
  }
  func.func @transform_2(%arg0: i32, %arg1: i32, %arg2: i32) -> (i32, i32) {
    %c0_i32 = arith.constant 0 : i32
    %c0_i32_0 = arith.constant 0 : i32
    return %c0_i32, %arg1 : i32, i32
  }
  func.func @transform_3(%arg0: i32, %arg1: i32, %arg2: i32) -> (i32, i32) {
    %c0_i32 = arith.constant 0 : i32
    return %arg0, %arg1 : i32, i32
  }
}

</mosaic_0001>

<bundles_post_ra>
// kernel: tpu_custom_call.1
= control target key start
LH: loop header
LB: loop body
LE: loop exit
PB: predicated region body
PF: predicated region fallthrough
CT: control target
= control target key end

     0   :  { %8 = vsyncpa [#allocation4], 0  ;;  %s313_s0 = inlined_call_operand.hbm [shape: bf16[16,32], index: 0, kind: input, shape index: {}]   ;;  %s314_s1 = inlined_call_operand.hbm [shape: bf16[32,96], index: 1, kind: input, shape index: {}]   ;;  %s315_s2 = inlined_call_operand.vmem [shape: bf16[1,96], index: 2, kind: input, shape index: {}]   ;;  %s316_s3 = inlined_call_operand.hbm [shape: bf16[16,96], index: 3, kind: output, shape index: {}]  }
   0x1   :  { %9 = vsyncpa [#allocation7], 0 }
   0x2   :  { %10 = vsyncpa [#allocation5], 0  ;;  %s261_s12 = smov [#allocation3]  }
   0x3   :  { %s16_s13 = sshll.u32 %s261_s12, 4  ;;  %s17_s13 = int_to_ptr.vmem [resolvable:$true] %s16_s13 }
   0x4   :  { %s203_s14 = scalar_lea.vmem %s17_s13, 128  ;;  %p208_p1 = scmp.lt.s32.totalorder %s17_s13, %s17_s13 }
   0x5   :  { %p204_p0 = scmp.ne.s32.totalorder %s17_s13, %s203_s14  ;;  %p209_p2 = scmp.lt.s32.totalorder %s203_s14, %s203_s14 }
   0x7   :  { %p210_p3 = por %p209_p2, %p208_p1 }
   0x9   :  { %p211_p4 = pnand %p210_p3, %p204_p0 }
   0xb   :  { %214 = shalt.err (!%p211_p4)
}
   0xc   :  { %s262_s15 = smov 64   ;;  %s263_s16 = smov 4  }
   0xd   :  { %22 = dma.hbm_to_vmem [thread:$0]  %s313_s0, 128, %s17_s13, [#allocation4], %s262_s15, %s262_s15, %s263_s16  }
   0xe   :  { %s264_s19 = smov [#allocation6]  }
   0xf   :  { %s28_s20 = sshll.u32 %s264_s19, 4  ;;  %s29_s20 = int_to_ptr.vmem [resolvable:$true] %s28_s20 }
  0x10   :  { %s223_s21 = scalar_lea.vmem %s29_s20, 256  ;;  %p228_p6 = scmp.lt.s32.totalorder %s29_s20, %s29_s20 }
  0x11   :  { %p224_p5 = scmp.ne.s32.totalorder %s29_s20, %s223_s21  ;;  %p229_p7 = scmp.lt.s32.totalorder %s223_s21, %s223_s21 }
  0x13   :  { %p230_p8 = por %p229_p7, %p228_p6 }
  0x15   :  { %p231_p9 = pnand %p230_p8, %p224_p5 }
  0x17   :  { %234 = shalt.err (!%p231_p9)
}
  0x18   :  { %34 = dma.hbm_to_vmem [thread:$0]  %s314_s1, 256, %s29_s20, [#allocation7], %s262_s15, %s262_s15, %s263_s16  }
  0x19   :  { %255 = dma.done.wait [#allocation4], 128  }
  0x1a   :  { %256 = vsyncadd [#allocation4], 4294967168 }
  0x1b   :  { %257 = dma.done.wait [#allocation7], 256  }
  0x1c   :  { %258 = vsyncadd [#allocation7], 4294967040  ;;  %v265_v0 = vmov 0.0   ;;  %vm266_vm0 = vmmov 0   ;;  %v50_v1 = vlaneseq  ;;  %v192_v3 = vld [vmem:[#allocation6 + $0x8] sm:$0xff]   ;;  %v193_v4 = vld [vmem:[#allocation6] sm:$0xff]  }
  0x1d   :  { %177 = vmatprep.subr.bf16.mxu0 %v265_v0  ;;  %181 = vmatprep.mubr.msk.bf16.mxu0 %vm266_vm0, %v265_v0  ;;  %v48_v6 = vld [vmem:[%s315_s2] sm:$0x1]  ;;  %v194_v8 = vld [vmem:[#allocation3] sm:$0xff]   ;;  %vm54_vm1 = vcmask 785408   ;;  %vm82_vm2 = vcmask 261120   ;;  %vm145_vm3 = vcmask 781312  }
  0x1e   :  { %v51_v2 = vshrl.u32 %v50_v1, 7  ;;  %178 = vmatpush3.bf16.msra.mxu0 %v192_v3  ;;  %v49_v7 = vunpack.c.l.bf16 %v48_v6  ;;  %s267_s1 = smov [#allocation8]  }
  0x1f   :  { %179 = vmatprep.subr.bf16.mxu0 %v265_v0  ;;  %s153_s2 = sshll.u32 %s267_s1, 4  ;;  %s154_s2 = int_to_ptr.vmem [resolvable:$true] %s153_s2 }
  0x20   :  { %v52_v5 = vsub.s32 0, %v51_v2  ;;  %s235_s25 = scalar_lea.vmem %s154_s2, 128  ;;  %p240_p11 = scmp.lt.s32.totalorder %s154_s2, %s154_s2 }
  0x21   :  { %p236_p10 = scmp.ne.s32.totalorder %s154_s2, %s235_s25  ;;  %p241_p12 = scmp.lt.s32.totalorder %s235_s25, %s235_s25 }
  0x22   :  { %180 = vmatpush3.bf16.msra.mxu0 %v193_v4  ;;  %v53_v9 = vrot.slane %v49_v7, %v52_v5 }
  0x23   :  { %p242_p13 = por %p241_p12, %p240_p11 }
  0x24   :  { %55 = vst.msk [vmem:[#allocation2] sm:$0xff] %vm54_vm1, %v53_v9  ;;  %56 = vst.msk [vmem:[#allocation2 + $0x8] sm:$0xff] %vm54_vm1, %v53_v9 }
  0x25   :  { %182 = vmatmul.mubr.msk.bf16.vlgmr.msra.gmra.mxu0 %vm82_vm2, %v194_v8  ;;  %p243_p0 = pnand %p242_p13, %p236_p10 }
  0x2b   :  { %v57_v10 = vld [vmem:[#allocation2] sm:$0xff]  ;;  %v58_v14 = vld [vmem:[#allocation2 + $0x8] sm:$0xff] }
  0xe5   :  { %v120_v11 = vpop.f32.mrf.mxu0 }
  0xe6   :  { %v127_v12 = vadd.f32 %v120_v11, %v57_v10 }
  0xe7   :  { %v183_v13 = vpop.f32.mrf.mxu0 }
  0xe8   :  { %130 = vst.msk [vmem:[#allocation2] sm:$0xff] %vm54_vm1, %v127_v12 }
  0xe9   :  { %v123_v15 = vpop.f32.mrf.mxu0 }
  0xea   :  { %v128_v16 = vadd.f32 %v123_v15, %v58_v14 }
  0xeb   :  { %v184_v17 = vpop.f32.mrf.mxu0 }
  0xec   :  { %131 = vst.msk [vmem:[#allocation2 + $0x8] sm:$0xff] %vm54_vm1, %v128_v16 }
  0xef   :  { %v135_v18 = vld [vmem:[#allocation2] sm:$0xff] }
  0xf0   :  { %v172_v19 = vpack.c.bf16 %v135_v18, %v135_v18 }
  0xf2   :  { %146 = vst.msk [vmem:[#allocation8] sm:$0xf] %vm145_vm3, %v172_v19 }
  0xf3   :  { %v136_v20 = vld [vmem:[#allocation2 + $0x8] sm:$0xff] }
  0xf4   :  { %v173_v21 = vpack.c.bf16 %v136_v20, %v136_v20 }
  0xf6   :  { %147 = vst.msk [vmem:[#allocation8 + $0x4] sm:$0xf] %vm145_vm3, %v173_v21 }
  0xf7   :  { %246 = shalt.err (!%p243_p0)
}
  0xf8   :  { %159 = dma.vmem_to_hbm [thread:$0]  %s154_s2, 128, %s316_s3, [#allocation5], %s262_s15, %s262_s15, %s263_s16  }
  0xf9   :  { %259 = dma.done.wait [#allocation5], 128  }
  0xfa   :  { %260 = vsyncadd [#allocation5], 4294967168 }
  0xfb   :  { %163 = vsyncpa [#allocation4], 1 }
  0xfc   :  { %164 = vsyncpa [#allocation7], 1 }
  0xfd   :  { %165 = vsyncpa [#allocation5], 1 }

</bundles_post_ra>
